<compile_context>
chip_gen: v5e
topology: v5e:2x2
jax: 0.10.0
libtpu: 0.0.40
codegen_flags: <defaults>
</compile_context>

<pallas_src>
from dataclasses import dataclass, field
from enum import Enum, auto
from typing import Any, List

import jax
import jax.numpy as jnp
from jax.experimental import pallas as pl
from jax.experimental.pallas import tpu as pltpu


# ----------------------------------------------------------------------------
# DTensor tagging metadata (faithful port of the PyTorch dataclasses; these
# are pure annotations and do not affect the forward computation).
# ----------------------------------------------------------------------------
class DTensorType(Enum):
    REPLICATED = auto()
    SHARDED = auto()
    PARTIAL = auto()


@dataclass
class DTensorTag:
    dttype: DTensorType = DTensorType.REPLICATED
    pg: Any = None


@dataclass
class Param:
    value: jnp.ndarray
    _dtags: List[DTensorTag] = field(default_factory=list)


# ----------------------------------------------------------------------------
# Pallas kernel: fused Linear -> ReLU -> Linear for one batch tile.
# Weights/biases are whole-array VMEM residents (they fit easily); the batch
# axis is the only grid axis and is megacore-parallel.
# ----------------------------------------------------------------------------
def _mlp_kernel(x_ref, w1_ref, b1_ref, w2_ref, b2_ref, o_ref):
    # x: (TM, DIN) bf16; w1: (DIN, HID) bf16; b1: (1, HID) f32
    # w2: (HID, DOUT) bf16; b2: (1, DOUT) f32; o: (TM, DOUT) f32
    x = x_ref[...]
    h = jnp.dot(x, w1_ref[...], preferred_element_type=jnp.float32)
    h = h + b1_ref[...]                         # broadcast (1, H) over batch rows
    h = jnp.maximum(h, 0.0)                     # ReLU on the VPU
    # Intentional mixed-precision: downcast the f32 accumulator to bf16 for
    # the second MXU matmul (activation precision bf16, accumulation f32).
    h_bf16 = h.astype(jnp.bfloat16)
    o = jnp.dot(h_bf16, w2_ref[...], preferred_element_type=jnp.float32)
    o = o + b2_ref[...]
    o_ref[...] = o.astype(o_ref.dtype)


def mlp_forward(x, w1_t, b1, w2_t, b2, *, tm=32):
    """x: [B, Din] bf16; w1_t: [Din, H] bf16; b1: [1, H] f32;
    w2_t: [H, Dout] bf16; b2: [1, Dout] f32.  Returns f32 [B, Dout].

    B must be a multiple of `tm`; tm must be a multiple of 16 (bf16 sublane
    tile); Din/H/Dout must be multiples of 128 (lane tile)."""
    B, Din = x.shape
    H = w1_t.shape[1]
    Dout = w2_t.shape[1]
    assert B % tm == 0 and tm % 16 == 0
    assert Din % 128 == 0 and H % 128 == 0 and Dout % 128 == 0

    flops = 2 * B * Din * H + 2 * B * H * Dout
    bytes_accessed = (x.size * x.dtype.itemsize
                      + w1_t.size * w1_t.dtype.itemsize
                      + b1.size * b1.dtype.itemsize
                      + w2_t.size * w2_t.dtype.itemsize
                      + b2.size * b2.dtype.itemsize
                      + B * Dout * 4)

    return pl.pallas_call(
        _mlp_kernel,
        out_shape=jax.ShapeDtypeStruct((B, Dout), jnp.float32),
        grid_spec=pl.GridSpec(
            grid=(B // tm,),
            in_specs=[
                pl.BlockSpec((tm, Din), lambda i: (i, 0)),     # batch-tiled x
                pl.BlockSpec((Din, H), lambda i: (0, 0)),      # resident W1
                pl.BlockSpec((1, H), lambda i: (0, 0)),        # resident b1
                pl.BlockSpec((H, Dout), lambda i: (0, 0)),     # resident W2
                pl.BlockSpec((1, Dout), lambda i: (0, 0)),     # resident b2
            ],
            out_specs=pl.BlockSpec((tm, Dout), lambda i: (i, 0)),
        ),
        compiler_params=pltpu.CompilerParams(
            # batch axis is independent -> shards across v7x's 2 TensorCores
            dimension_semantics=("parallel",),
            # tiny footprint; set explicitly so v7x's 64 MiB VMEM never bites
            vmem_limit_bytes=32 * 1024 * 1024,
        ),
        cost_estimate=pl.CostEstimate(
            flops=flops, transcendentals=0, bytes_accessed=bytes_accessed),
    )(x, w1_t, b1, w2_t, b2)


# ----------------------------------------------------------------------------
# Representative wrapped module + DDP wrapper.
# ----------------------------------------------------------------------------
class InnerMLP:
    """Wrapped module: Linear(Din, H) -> ReLU -> Linear(H, Dout).
    Weights stored transposed ([in, out]) in bf16; biases in f32."""

    def __init__(self, din, hidden, dout, key):
        k1, k2, k3, k4 = jax.random.split(key, 4)
        # nn.Linear default init: U(-1/sqrt(fan_in), 1/sqrt(fan_in))
        lim1 = 1.0 / jnp.sqrt(jnp.float32(din))
        lim2 = 1.0 / jnp.sqrt(jnp.float32(hidden))
        self.w1_t = Param(jax.random.uniform(
            k1, (din, hidden), jnp.float32, -lim1, lim1).astype(jnp.bfloat16))
        self.b1 = Param(jax.random.uniform(
            k2, (1, hidden), jnp.float32, -lim1, lim1))
        self.w2_t = Param(jax.random.uniform(
            k3, (hidden, dout), jnp.float32, -lim2, lim2).astype(jnp.bfloat16))
        self.b2 = Param(jax.random.uniform(
            k4, (1, dout), jnp.float32, -lim2, lim2))

    def parameters(self):
        return [self.w1_t, self.b1, self.w2_t, self.b2]

    def __call__(self, x):
        return mlp_forward(x, self.w1_t.value, self.b1.value,
                           self.w2_t.value, self.b2.value)


class DDP:
    """Tag each param as replicated; forward is a pass-through to the module."""

    def __init__(self, module, pg=None):
        self.module = module
        for p in module.parameters():
            p._dtags.append(DTensorTag(dttype=DTensorType.REPLICATED, pg=pg))

    def __call__(self, *args, **kwargs):
        return self.module(*args, **kwargs)
    # TODO(synk): gradient-bucket all-reduce (the real DDP cost) belongs in a
    # backward-path Pallas ring (make_async_remote_copy + barrier sem); the
    # forward pass has no communication.


if __name__ == "__main__":
    key = jax.random.PRNGKey(0)
    k_in, k_mod = jax.random.split(key)

    # 128-aligned feature dims (full-lane vregs, unmasked stores),
    # batch a multiple of the bf16 sublane tile (16); tiled TM=32 -> grid (2,).
    B, DIN, HID, DOUT = 64, 128, 128, 128
    x = jax.random.normal(k_in, (B, DIN), dtype=jnp.float32).astype(jnp.bfloat16)

    inner = InnerMLP(DIN, HID, DOUT, k_mod)
    ddp = DDP(inner, pg=None)

    # sanity: every param got a REPLICATED tag (the whole point of DDP here)
    assert all(p._dtags and p._dtags[0].dttype == DTensorType.REPLICATED
               for p in inner.parameters())

    out = ddp(x)
    out = jax.block_until_ready(out)

    # numerical check against a plain-JAX reference that mirrors the kernel's
    # mixed precision (bf16 operands, f32 accumulation, bf16 hidden activation)
    h_ref = jnp.dot(x, inner.w1_t.value,
                    preferred_element_type=jnp.float32) + inner.b1.value
    h_ref = jnp.maximum(h_ref, 0.0).astype(jnp.bfloat16)
    ref = jnp.dot(h_ref, inner.w2_t.value,
                  preferred_element_type=jnp.float32) + inner.b2.value

    assert out.shape == (B, DOUT)
    assert out.dtype == jnp.float32
    assert jnp.allclose(out, ref, atol=1e-2, rtol=1e-2)

    print("KERNEL_OK")
</pallas_src>

<mosaic_0001>
module attributes {stable_mosaic.version = 11 : i64} {
  func.func @_mlp_kernel(%arg0: i32, %arg1: memref<32x128xbf16, #tpu.memory_space<vmem>>, %arg2: memref<128x128xbf16, #tpu.memory_space<vmem>>, %arg3: memref<1x128xf32, #tpu.memory_space<vmem>>, %arg4: memref<128x128xbf16, #tpu.memory_space<vmem>>, %arg5: memref<1x128xf32, #tpu.memory_space<vmem>>, %arg6: memref<32x128xf32, #tpu.memory_space<vmem>>) attributes {dimension_semantics = [#tpu.dimension_semantics<parallel>], iteration_bounds = array<i64: 2>, scalar_prefetch = 0 : i64, scratch_operands = 0 : i64, tpu.core_type = #tpu.core_type<tc>, window_params = [{transform_indices = @transform_0, window_bounds = array<i64: 32, 128>}, {pipeline_mode = #tpu.pipeline_mode<synchronous>, transform_indices = @transform_1, window_bounds = array<i64: 128, 128>}, {pipeline_mode = #tpu.pipeline_mode<synchronous>, transform_indices = @transform_2, window_bounds = array<i64: 1, 128>}, {pipeline_mode = #tpu.pipeline_mode<synchronous>, transform_indices = @transform_3, window_bounds = array<i64: 128, 128>}, {pipeline_mode = #tpu.pipeline_mode<synchronous>, transform_indices = @transform_4, window_bounds = array<i64: 1, 128>}, {transform_indices = @transform_5, window_bounds = array<i64: 32, 128>}]} {
    %c0 = arith.constant 0 : index
    %c0_0 = arith.constant 0 : index
    %0 = vector.load %arg1[%c0, %c0_0] : memref<32x128xbf16, #tpu.memory_space<vmem>>, vector<32x128xbf16>
    %c0_1 = arith.constant 0 : index
    %c0_2 = arith.constant 0 : index
    %1 = vector.load %arg2[%c0_1, %c0_2] : memref<128x128xbf16, #tpu.memory_space<vmem>>, vector<128x128xbf16>
    %cst = arith.constant dense<0.000000e+00> : vector<32x128xf32>
    %2 = tpu.matmul %0, %1, %cst {dimension_numbers = #tpu.dot_dimension_numbers<[1], [0], [0], [1], [0, 0, 1, 1], [], []>} : vector<32x128xbf16>, vector<128x128xbf16>, vector<32x128xf32> -> vector<32x128xf32>
    %c0_3 = arith.constant 0 : index
    %c0_4 = arith.constant 0 : index
    %3 = vector.load %arg3[%c0_3, %c0_4] : memref<1x128xf32, #tpu.memory_space<vmem>>, vector<1x128xf32>
    %4 = vector.broadcast %3 : vector<1x128xf32> to vector<32x128xf32>
    %5 = arith.addf %2, %4 : vector<32x128xf32>
    %cst_5 = arith.constant 0.000000e+00 : f32
    %6 = vector.broadcast %cst_5 : f32 to vector<32x128xf32>
    %7 = arith.maximumf %5, %6 : vector<32x128xf32>
    %8 = arith.truncf %7 : vector<32x128xf32> to vector<32x128xbf16>
    %c0_6 = arith.constant 0 : index
    %c0_7 = arith.constant 0 : index
    %9 = vector.load %arg4[%c0_6, %c0_7] : memref<128x128xbf16, #tpu.memory_space<vmem>>, vector<128x128xbf16>
    %cst_8 = arith.constant dense<0.000000e+00> : vector<32x128xf32>
    %10 = tpu.matmul %8, %9, %cst_8 {dimension_numbers = #tpu.dot_dimension_numbers<[1], [0], [0], [1], [0, 0, 1, 1], [], []>} : vector<32x128xbf16>, vector<128x128xbf16>, vector<32x128xf32> -> vector<32x128xf32>
    %c0_9 = arith.constant 0 : index
    %c0_10 = arith.constant 0 : index
    %11 = vector.load %arg5[%c0_9, %c0_10] : memref<1x128xf32, #tpu.memory_space<vmem>>, vector<1x128xf32>
    %12 = vector.broadcast %11 : vector<1x128xf32> to vector<32x128xf32>
    %13 = arith.addf %10, %12 : vector<32x128xf32>
    %c0_11 = arith.constant 0 : index
    %c0_12 = arith.constant 0 : index
    %14 = vector.load %arg6[%c0_11, %c0_12] : memref<32x128xf32, #tpu.memory_space<vmem>>, vector<32x128xf32>
    tpu.vector_store %arg6[%c0_11, %c0_12], %13 {strides = array<i32>} : memref<32x128xf32, #tpu.memory_space<vmem>>, vector<32x128xf32>,
    return
  }
  func.func @transform_0(%arg0: i32) -> (i32, i32) {
    %c0_i32 = arith.constant 0 : i32
    %c0_i32_0 = arith.constant 0 : i32
    return %arg0, %c0_i32 : i32, i32
  }
  func.func @transform_1(%arg0: i32) -> (i32, i32) {
    %c0_i32 = arith.constant 0 : i32
    %c0_i32_0 = arith.constant 0 : i32
    %c0_i32_1 = arith.constant 0 : i32
    return %c0_i32, %c0_i32_0 : i32, i32
  }
  func.func @transform_2(%arg0: i32) -> (i32, i32) {
    %c0_i32 = arith.constant 0 : i32
    %c0_i32_0 = arith.constant 0 : i32
    %c0_i32_1 = arith.constant 0 : i32
    return %c0_i32, %c0_i32_0 : i32, i32
  }
  func.func @transform_3(%arg0: i32) -> (i32, i32) {
    %c0_i32 = arith.constant 0 : i32
    %c0_i32_0 = arith.constant 0 : i32
    %c0_i32_1 = arith.constant 0 : i32
    return %c0_i32, %c0_i32_0 : i32, i32
  }
  func.func @transform_4(%arg0: i32) -> (i32, i32) {
    %c0_i32 = arith.constant 0 : i32
    %c0_i32_0 = arith.constant 0 : i32
    %c0_i32_1 = arith.constant 0 : i32
    return %c0_i32, %c0_i32_0 : i32, i32
  }
  func.func @transform_5(%arg0: i32) -> (i32, i32) {
    %c0_i32 = arith.constant 0 : i32
    %c0_i32_0 = arith.constant 0 : i32
    return %arg0, %c0_i32 : i32, i32
  }
}

</mosaic_0001>

<bundles_post_ra>
// kernel: tpu_custom_call.1
= control target key start
LH: loop header
LB: loop body
LE: loop exit
PB: predicated region body
PF: predicated region fallthrough
CT: control target
= control target key end

     0   :  { %10 = vsyncpa [#allocation3], 0  ;;  %s1146_s0 = inlined_call_operand.hbm [shape: bf16[64,128], index: 0, kind: input, shape index: {}]   ;;  %s1147_s1 = inlined_call_operand.hbm [shape: bf16[128,128], index: 1, kind: input, shape index: {}]   ;;  %s1148_s2 = inlined_call_operand.vmem [shape: f32[1,128], index: 2, kind: input, shape index: {}]   ;;  %s1149_s3 = inlined_call_operand.hbm [shape: bf16[128,128], index: 3, kind: input, shape index: {}]   ;;  %s1150_s4 = inlined_call_operand.vmem [shape: f32[1,128], index: 4, kind: input, shape index: {}]   ;;  %s1151_s5 = inlined_call_operand.hbm [shape: f32[64,128], index: 5, kind: output, shape index: {}]  }
   0x1   :  { %12 = vsyncpa [#allocation3 + $0x1], 0 }
   0x2   :  { %13 = vsyncpa [#allocation6], 0 }
   0x3   :  { %14 = vsyncpa [#allocation4], 0 }
   0x4   :  { %16 = vsyncpa [#allocation4 + $0x1], 0  ;;  %s985_s18 = smov 0   ;;  %s987_s19 = smov 0  }
   0x5   :  { %s989_s20 = smov 0   ;;  %s991_s21 = smov 0  }
   0x6 LB: > { %s1006_s22 = sadd.s32 4294967295, %s947_s21   ;;  %s588_s23 = sadd.s32 4294967294, %s947_s21   ;;  %s947_s21 = sphi %s991_s21, %s1163_s21   ;;  %s943_s20 = sphi %s989_s20, %s1162_s20   ;;  %s939_s19 = sphi %s987_s19, %s1161_s19   ;;  %s935_s18 = sphi %s985_s18, %s1160_s18  }
   0x7   : > { %p42_p0 = scmp.ne.s32.totalorder %s939_s19, %s935_s18  ;;  %p43_p1 = scmp.eq.s32.totalorder %s1006_s22, 0 }
   0x8   : > { %p150_p2 = scmp.eq.s32.totalorder %s1006_s22, 1  ;;  %p156_p3 = scmp.eq.s32.totalorder %s588_s23, 1 }
   0x9   : > { %p1015_p4 = por %p43_p1, %p42_p0  ;;  %p589_p5 = scmp.ge.s32.totalorder %s947_s21, 1 }
   0xa   : > { %p1020_p6 = por %p156_p3, %p42_p0  ;;  %p163_p7 = scmp.lt.s32.totalorder %s947_s21, 3 }
   0xb   : > { %s174_s28 = sshll.u32 %s1147_s1, 4  ;;  %s949_s30 = smov [#allocation5]   ;;  %s175_s28 = int_to_ptr.hbm [resolvable:$true] %s174_s28 }
   0xc   : > { %p1028_p8 = pnand %p589_p5, %p163_p7  ;;  %s176_s6 = sshll.u32 %s949_s30, 4  ;;  %s177_s6 = int_to_ptr.vmem [resolvable:$true] %s176_s6 }
   0xd   : > { %s191_s9 = sshll.u32 %s1149_s3, 4  ;;  %s1152_s10 = smov 64   ;;  %s192_s9 = int_to_ptr.hbm [resolvable:$true] %s191_s9 }
   0xe   : > { %p726_p9 = pneg %p1028_p8  ;;  %s951_s11 = smov 4  }
   0xf   : > { %s952_s12 = smov [#allocation7]   ;;  %s1047_s14 = sadd.s32 1, %s947_s21  }
  0x10   : > { %p727_p10 = pnand %p726_p9, %p43_p1  ;;  %s193_s13 = sshll.u32 %s952_s12, 4  ;;  %s194_s13 = int_to_ptr.vmem [resolvable:$true] %s193_s13 }
  0x11   : > { %s29_s15 = sadd.s32 1, %s943_s20  ;;  %s26_s16 = ssub.s32 %s947_s21, %s1047_s14 }
  0x12   : > { %729 = dma.hbm_to_vmem [thread:$0]  (!%p727_p10), %s175_s28, 1024, %s177_s6, [#allocation6], %s1152_s10, %s1152_s10, %s951_s11  }
  0x13   : > { %732 = dma.hbm_to_vmem [thread:$0]  (!%p727_p10), %s192_s9, 1024, %s194_s13, [#allocation6], %s1152_s10, %s1152_s10, %s951_s11  }
  0x14   : > { %p36_p12 = scmp.ne.s32.totalorder %s943_s20, %s939_s19  ;;  %p27_p13 = scmp.eq.s32.totalorder %s26_s16, 0 }
  0x15   : > { %p37_p0 = scmp.eq.s32.totalorder %s947_s21, 0  ;;  %p743_p5 = scmp.lt.s32.totalorder %s947_s21, 2 }
  0x16   : > { %p1057_p3 = por %p150_p2, %p36_p12  ;;  %s210_s26 = sand.u32 1, %s943_s20  }
  0x17   : > { %s1063_s23 = scalar_select %p27_p13, %s943_s20, %s29_s15  }
  0x18   : > { %p38_p7 = por %p37_p0, %p36_p12  ;;  %s593_s27 = sshll.u32 %s210_s26, 4 }
  0x19   : > { %s678_s28 = sshll.u32 %s947_s21, 4  ;;  %s214_s8 = scalar_lea.vmem [#allocation2], %s593_s27 }
  0x1a   : > { %s219_s7 = scalar_lea.hbm %s1146_s0, %s678_s28  ;;  %s222_s9 = sshll.u32 %s214_s8, 4  ;;  %s223_s9 = int_to_ptr.vmem [resolvable:$true] %s222_s9 }
  0x1b   : > { %s220_s12 = sshll.u32 %s219_s7, 4  ;;  %p1070_p2 = pnand %p743_p5, %p38_p7  ;;  %s221_s12 = int_to_ptr.hbm [resolvable:$true] %s220_s12 }
  0x1c   : > { %s211_s15 = scalar_lea.sflag [#allocation3], %s210_s26  ;;  %s847_s16 = sshra.s32 %s221_s12, 4  ;;  %s848_s16 = int_to_ptr.hbm [resolvable:$true] %s847_s16 }
  0x1d   : > { %s849_s10 = scalar_lea.hbm %s848_s16, 16  ;;  %p851_p10 = pneg %p1070_p2 }
  0x1e   : > { %p850_p9 = scmp.ne.s32.totalorder %s848_s16, %s849_s10  ;;  %s854_s30 = scalar_lea.hbm %s1146_s0, 32 }
  0x1f   : > { %p855_p0 = scmp.lt.s32.totalorder %s848_s16, %s1146_s0  ;;  %p856_p5 = scmp.lt.s32.totalorder %s854_s30, %s849_s10 }
  0x20   : > { %p852_p12 = pnand %p851_p10, %p850_p9 }
  0x21   : > { %p857_p7 = por %p856_p5, %p855_p0 }
  0x22   : > { %p853_p13 = pneg %p852_p12 }
  0x24   : > { %p858_p11 = pnand %p857_p7, %p853_p13 }
  0x26   : > { %861 = shalt.err (!%p858_p11)
}
  0x27   : > { %s1158_s26 = smov 64   ;;  %234 = sbr.rel (%p1028_p8) target bundleno = 371 (0x173), region = 40 }
  0x28   : > { %736 = dma.hbm_to_vmem [thread:$0]  (!%p1070_p2), %s221_s12, 256, %s223_s9, %s211_s15, %s1158_s26, %s1158_s26, %s951_s11  }
  0x29   : > { %s1090_s8 = sand.u32 (!%p1028_p8), 1, %s939_s19  }
  0x2a   : > { %s597_s16 = sshll.u32 (!%p1028_p8), %s1090_s8, 4  ;;  %s237_s10 = scalar_lea.sflag (!%p1028_p8), [#allocation3], %s1090_s8 }
  0x2b   : > { %s1094_s28 = scalar_lea.vmem (!%p1028_p8), [#allocation2], %s597_s16 }
  0x2c   : > { %922 = dma.done.wait (%p1015_p4), %s237_s10, 256  }
  0x2d   : > { %924 = vsyncadd (%p1015_p4), %s237_s10, 4294967040 }
  0x2e   : > { %926 = dma.done.wait (%p43_p1), [#allocation6], 2048  }
  0x2f   : > { %928 = vsyncadd (%p43_p1), [#allocation6], 4294965248  ;;  %v688_v0 = vld [vmem:[#allocation5 + $0x38] sm:$0xff]  ;;  %v687_v1 = vld [vmem:[#allocation5 + $0x30] sm:$0xff]  ;;  %s600_s11 = sshll.u32 %s1090_s8, 5  ;;  %s697_s15 = sshll.u32 %s1006_s22, 5 }
  0x30   : > { %364 = vmatpush.bf16.msra.mxu0 %v688_v0  ;;  %698 = vmatpush.bf16.msra.mxu2 %v688_v0  ;;  %v696_v2 = vld [vmem:[#allocation7 + $0x38] sm:$0xff]  ;;  %v695_v3 = vld [vmem:[#allocation7 + $0x30] sm:$0xff]  ;;  %v686_v4 = vld [vmem:[#allocation5 + $0x28] sm:$0xff]  ;;  %s277_s13 = scalar_lea.vmem [#allocation8], %s600_s11  ;;  %s492_s6 = scalar_lea.hbm %s1151_s5, %s697_s15 }
  0x31   : > { %457 = vmatpush.bf16.msra.mxu1 %v696_v2  ;;  %706 = vmatpush.bf16.msra.mxu3 %v696_v2  ;;  %v694_v5 = vld [vmem:[#allocation7 + $0x28] sm:$0xff]  ;;  %v685_v6 = vld [vmem:[#allocation5 + $0x20] sm:$0xff]  ;;  %v684_v8 = vld [vmem:[#allocation5 + $0x18] sm:$0xff]  ;;  %s493_s7 = sshll.u32 %s277_s13, 4  ;;  %s495_s26 = sshll.u32 %s492_s6, 4  ;;  %s494_s7 = int_to_ptr.vmem [resolvable:$true] %s493_s7  ;;  %s496_s26 = int_to_ptr.hbm [resolvable:$true] %s495_s26 }
  0x32   : > { %v693_v7 = vld [vmem:[#allocation7 + $0x20] sm:$0xff]  ;;  %v683_v9 = vld [vmem:[#allocation5 + $0x10] sm:$0xff]  ;;  %v682_v10 = vld [vmem:[#allocation5 + $0x8] sm:$0xff]  ;;  %s481_s16 = scalar_lea.sflag [#allocation4], %s1090_s8  ;;  %s891_s10 = sshra.s32 %s496_s26, 4  ;;  %s892_s10 = int_to_ptr.hbm [resolvable:$true] %s891_s10 }
  0x33   : > { %v681_v11 = vld [vmem:[#allocation5] sm:$0xff]  ;;  %v680_v13 = vld [vmem:[%s1094_s28 + $0x8] sm:$0xff]  ;;  %v691_v15 = vld [vmem:[#allocation7 + $0x10] sm:$0xff]  ;;  %s897_s29 = scalar_lea.hbm %s1151_s5, 64  ;;  %p898_p11 = scmp.lt.s32.totalorder %s892_s10, %s1151_s5 }
  0x34   : > { %365 = vmatpush.bf16.msra.mxu0 %v687_v1  ;;  %699 = vmatpush.bf16.msra.mxu2 %v687_v1  ;;  %v679_v12 = vld [vmem:[%s1094_s28] sm:$0xff]  ;;  %v692_v14 = vld [vmem:[#allocation7 + $0x18] sm:$0xff]  ;;  %v690_v16 = vld [vmem:[#allocation7 + $0x8] sm:$0xff]  ;;  %s893_s28 = scalar_lea.hbm %s892_s10, 32 }
  0x35   : > { %458 = vmatpush.bf16.msra.mxu1 %v695_v3  ;;  %707 = vmatpush.bf16.msra.mxu3 %v695_v3  ;;  %v689_v17 = vld [vmem:[#allocation7] sm:$0xff]  ;;  %p894_p1 = scmp.ne.s32.totalorder %s892_s10, %s893_s28  ;;  %p899_p2 = scmp.lt.s32.totalorder %s897_s29, %s893_s28 }
  0x36   : > { %v785_v19 = vld [vmem:[%s1148_s2] ss:$0 sm:$0xff] }
  0x37   : > { %v786_v33 = vld [vmem:[%s1150_s4] ss:$0 sm:$0xff]  ;;  %p895_p4 = pnand %p894_p1, %p1057_p3  ;;  %p900_p9 = por %p899_p2, %p898_p11 }
  0x38   : > { %366 = vmatpush.bf16.msra.mxu0 %v686_v4  ;;  %700 = vmatpush.bf16.msra.mxu2 %v686_v4 }
  0x39   : > { %459 = vmatpush.bf16.msra.mxu1 %v694_v5  ;;  %708 = vmatpush.bf16.msra.mxu3 %v694_v5  ;;  %p896_p8 = pneg %p895_p4 }
  0x3b   : > { %p901_p10 = pnand %p900_p9, %p896_p8 }
  0x3c   : > { %367 = vmatpush.bf16.msra.mxu0 %v685_v6  ;;  %701 = vmatpush.bf16.msra.mxu2 %v685_v6 }
  0x3d   : > { %460 = vmatpush.bf16.msra.mxu1 %v693_v7  ;;  %709 = vmatpush.bf16.msra.mxu3 %v693_v7 }
  0x40   : > { %368 = vmatpush.bf16.msra.mxu0 %v684_v8  ;;  %702 = vmatpush.bf16.msra.mxu2 %v684_v8 }
  0x41   : > { %461 = vmatpush.bf16.msra.mxu1 %v692_v14  ;;  %710 = vmatpush.bf16.msra.mxu3 %v692_v14 }
  0x44   : > { %369 = vmatpush.bf16.msra.mxu0 %v683_v9  ;;  %703 = vmatpush.bf16.msra.mxu2 %v683_v9 }
  0x45   : > { %462 = vmatpush.bf16.msra.mxu1 %v691_v15  ;;  %711 = vmatpush.bf16.msra.mxu3 %v691_v15 }
  0x48   : > { %370 = vmatpush.bf16.msra.mxu0 %v682_v10  ;;  %704 = vmatpush.bf16.msra.mxu2 %v682_v10 }
  0x49   : > { %463 = vmatpush.bf16.msra.mxu1 %v690_v16  ;;  %712 = vmatpush.bf16.msra.mxu3 %v690_v16 }
  0x4c   : > { %371 = vmatpush.bf16.msra.mxu0 %v681_v11  ;;  %705 = vmatpush.bf16.msra.mxu2 %v681_v11 }
  0x4d   : > { %464 = vmatpush.bf16.msra.mxu1 %v689_v17  ;;  %713 = vmatpush.bf16.msra.mxu3 %v689_v17 }
  0x4f   : > { %372 = vmatmul.bf16.vlgmr.msra.gmra.mxu0 %v679_v12  ;;  %377 = vmatmul.bf16.vlgmr.msra.gmra.mxu2 %v680_v13 }
  0xcc   : > { %v373_v18 = vpop.f32.mrf.mxu0 }
  0xcd   : > { %v374_v20 = vadd.f32 %v785_v19, %v373_v18 }
  0xcf   : > { %v383_v23 = vmax.f32 %v374_v20, 0.0 }
  0xd2   : > { %v378_v21 = vpop.f32.mrf.mxu2 }
  0xd3   : > { %v379_v26 = vadd.f32 %v785_v19, %v378_v21 }
  0xd4   : > { %v375_v22 = vpop.f32.mrf.mxu0 }
  0xd5   : > { %v376_v24 = vadd.f32 %v785_v19, %v375_v22  ;;  %v385_v30 = vmax.f32 %v379_v26, 0.0 }
  0xd7   : > { %v384_v25 = vmax.f32 %v376_v24, 0.0 }
  0xd9   : > { %v387_v27 = vpack.c.bf16 %v384_v25, %v383_v23 }
  0xda   : > { %v380_v28 = vpop.f32.mrf.mxu2 }
  0xdb   : > { %v381_v29 = vadd.f32 %v785_v19, %v380_v28  ;;  %465 = vmatmul.bf16.vlgmr.msra.gmra.mxu1 %v387_v27 }
  0xdd   : > { %v386_v31 = vmax.f32 %v381_v29, 0.0 }
  0xdf   : > { %v388_v32 = vpack.c.bf16 %v386_v31, %v385_v30 }
  0xe1   : > { %470 = vmatmul.bf16.vlgmr.msra.gmra.mxu3 %v388_v32 }
 0x158   : > { %v466_v34 = vpop.f32.mrf.mxu1 }
 0x159   : > { %v467_v35 = vadd.f32 %v786_v33, %v466_v34 }
 0x15b   : > { %476 = vst [vmem:[%s277_s13] sm:$0xff] %v467_v35 }
 0x160   : > { %v468_v36 = vpop.f32.mrf.mxu1 }
 0x161   : > { %v469_v37 = vadd.f32 %v786_v33, %v468_v36 }
 0x163   : > { %477 = vst [vmem:[%s277_s13 + $0x8] sm:$0xff] %v469_v37 }
 0x164   : > { %v471_v38 = vpop.f32.mrf.mxu3 }
 0x165   : > { %v472_v39 = vadd.f32 %v786_v33, %v471_v38 }
 0x167   : > { %478 = vst [vmem:[%s277_s13 + $0x10] sm:$0xff] %v472_v39 }
 0x16c   : > { %v473_v40 = vpop.f32.mrf.mxu3 }
 0x16d   : > { %v474_v41 = vadd.f32 %v786_v33, %v473_v40 }
 0x16f   : > { %479 = vst [vmem:[%s277_s13 + $0x18] sm:$0xff] %v474_v41 }
 0x170   : > { %904 = shalt.err (!%p901_p10)
}
 0x171   : > { %s953_s8 = smov 128   ;;  %s954_s12 = smov 8  }
 0x172   : > { %724 = dma.vmem_to_hbm [thread:$0]  (%p1057_p3), %s494_s7, 512, %s496_s26, %s481_s16, %s953_s8, %s953_s8, %s954_s12  }
 0x173 PF: > { %s510_s13 = sand.u32 1, %s935_s18   ;;  %p1159_p12 = scmp.ge.s32.totalorder %s947_s21, 2 }
 0x174   : > { %s511_s15 = scalar_lea.sflag [#allocation4], %s510_s13 }
 0x175   : > { %p738_p13 = pnand %p1159_p12, %p1020_p6 }
 0x177   : > { %p739_p0 = pneg %p738_p13 }
 0x179   : > { %930 = dma.done.wait (%p739_p0), %s511_s15, 512  }
 0x17a   : > { %932 = vsyncadd (%p739_p0), %s511_s15, 4294966784  ;;  %p19_p5 = scmp.ge.s32.totalorder %s1047_s14, 4   ;;  %s1160_s18 = smov %s939_s19 }
 0x17b   : > { %s1161_s19 = smov %s943_s20  ;;  %s1162_s20 = smov %s1063_s23 }
 0x17c   : > { %s1163_s21 = smov %s1047_s14  ;;  %21 = sbr.rel (!%p19_p5) target bundleno = 6 (0x6), region = 93 }
 0x181   :  { %517 = vsyncpa [#allocation3], 1 }
 0x182   :  { %519 = vsyncpa [#allocation3 + $0x1], 1 }
 0x183   :  { %520 = vsyncpa [#allocation6], 1 }
 0x184   :  { %521 = vsyncpa [#allocation4], 1 }
 0x185   :  { %523 = vsyncpa [#allocation4 + $0x1], 1 }

</bundles_post_ra>
